<compile_context>
chip_gen: v7x
topology: tpu7x:2x2x1
jax: 0.10.0
libtpu: 0.0.40
codegen_flags: <defaults>
</compile_context>

<pallas_src>
import jax
import jax.numpy as jnp
from jax.experimental import pallas as pl
from jax.experimental.pallas import tpu as pltpu


IN_DIM = 93
H1_DIM = 50
H2_DIM = 20
OUT_DIM = 9
LANE = 128  # lane-aligned padded feature width


def mlp_kernel(x_ref, w1_ref, b1_ref, w2_ref, b2_ref, w3_ref, b3_ref, o_ref):
    # Layer 1: Linear(128-padded 93 -> 50) + ReLU
    h1 = jnp.dot(x_ref[...], w1_ref[...], preferred_element_type=jnp.float32)
    h1 = jnp.maximum(h1 + b1_ref[...], 0.0)
    # Layer 2: Linear(50 -> 20) + ReLU
    h2 = jnp.dot(h1, w2_ref[...], preferred_element_type=jnp.float32)
    h2 = jnp.maximum(h2 + b2_ref[...], 0.0)
    # Layer 3: Linear(20 -> 9), logits (no activation)
    out = jnp.dot(h2, w3_ref[...], preferred_element_type=jnp.float32)
    o_ref[...] = (out + b3_ref[...]).astype(o_ref.dtype)


def mlp_forward(x, params, *, block_b=512):
    """x: (B, 93) float32 -> (B, 9) float32."""
    w1, b1, w2, b2, w3, b3 = params
    B, D = x.shape
    assert D == IN_DIM

    # Lane-pad the feature dim 93 -> 128 (zero columns; w1 padded to match).
    # Prefer storing data pre-padded upstream; padding here keeps the script
    # self-contained.
    x = jnp.pad(x, ((0, 0), (0, LANE - IN_DIM)))
    w1p = jnp.pad(w1, ((0, LANE - IN_DIM), (0, 0)))

    # Batch tile: as large as reasonable (512-class tiles hit ~85% of HBM
    # roofline), multiple of 8, never larger than (padded) batch.
    tb = min(block_b, B)
    tb = ((tb + 7) // 8) * 8
    b_pad = ((B + tb - 1) // tb) * tb
    if b_pad != B:
        x = jnp.pad(x, ((0, b_pad - B), (0, 0)))
    grid = (b_pad // tb,)

    out = pl.pallas_call(
        mlp_kernel,
        out_shape=jax.ShapeDtypeStruct((b_pad, OUT_DIM), jnp.float32),
        grid=grid,
        in_specs=[
            # x: tiled along the batch axis, lane-dense 128-wide rows.
            pl.BlockSpec((tb, LANE), lambda i: (i, 0)),
            # Weights / biases: constant block index -> stay VMEM-resident.
            pl.BlockSpec((LANE, H1_DIM), lambda i: (0, 0)),
            pl.BlockSpec((1, H1_DIM), lambda i: (0, 0)),
            pl.BlockSpec((H1_DIM, H2_DIM), lambda i: (0, 0)),
            pl.BlockSpec((1, H2_DIM), lambda i: (0, 0)),
            pl.BlockSpec((H2_DIM, OUT_DIM), lambda i: (0, 0)),
            pl.BlockSpec((1, OUT_DIM), lambda i: (0, 0)),
        ],
        out_specs=pl.BlockSpec((tb, OUT_DIM), lambda i: (i, 0)),
        compiler_params=pltpu.CompilerParams(
            dimension_semantics=("parallel",),  # shards batch across TCs on v7x
        ),
    )(x, w1p, b1, w2, b2, w3, b3)

    return out[:B]


def init_params(key):
    """Deterministic init mimicking PyTorch Linear's U(-1/sqrt(fan_in), 1/sqrt(fan_in))."""
    dims = [(IN_DIM, H1_DIM), (H1_DIM, H2_DIM), (H2_DIM, OUT_DIM)]
    params = []
    for fan_in, fan_out in dims:
        kw, kb, key = jax.random.split(key, 3)
        bound = 1.0 / jnp.sqrt(jnp.float32(fan_in))
        w = jax.random.uniform(kw, (fan_in, fan_out), jnp.float32, -bound, bound)
        b = jax.random.uniform(kb, (1, fan_out), jnp.float32, -bound, bound)
        params += [w, b]
    return tuple(params)


def mlp_reference(x, params):
    w1, b1, w2, b2, w3, b3 = params
    h1 = jnp.maximum(x @ w1 + b1, 0.0)
    h2 = jnp.maximum(h1 @ w2 + b2, 0.0)
    return h2 @ w3 + b3


if __name__ == "__main__":
    key = jax.random.PRNGKey(0)
    kx, kx2, kp = jax.random.split(key, 3)
    params = init_params(kp)

    # Small-batch check (single grid step).
    batch = 8
    x = jax.random.normal(kx, (batch, IN_DIM), dtype=jnp.float32)
    out = jax.block_until_ready(mlp_forward(x, params))
    ref = mlp_reference(x, params)
    assert out.shape == (batch, OUT_DIM)
    assert jnp.allclose(out, ref, atol=1e-5, rtol=1e-5)

    # Larger batch: exercises multi-step grid + partial-tile padding path.
    batch2 = 1000
    x2 = jax.random.normal(kx2, (batch2, IN_DIM), dtype=jnp.float32)
    out2 = jax.block_until_ready(mlp_forward(x2, params))
    ref2 = mlp_reference(x2, params)
    assert out2.shape == (batch2, OUT_DIM)
    assert jnp.allclose(out2, ref2, atol=1e-5, rtol=1e-5)

    print("KERNEL_OK")
</pallas_src>

<mosaic_0001>
module attributes {stable_mosaic.version = 11 : i64} {
  func.func @mlp_kernel(%arg0: i32, %arg1: memref<8x128xf32, #tpu.memory_space<vmem>>, %arg2: memref<128x50xf32, #tpu.memory_space<vmem>>, %arg3: memref<1x50xf32, #tpu.memory_space<vmem>>, %arg4: memref<50x20xf32, #tpu.memory_space<vmem>>, %arg5: memref<1x20xf32, #tpu.memory_space<vmem>>, %arg6: memref<20x9xf32, #tpu.memory_space<vmem>>, %arg7: memref<1x9xf32, #tpu.memory_space<vmem>>, %arg8: memref<8x9xf32, #tpu.memory_space<vmem>>) attributes {dimension_semantics = [#tpu.dimension_semantics<parallel>], iteration_bounds = array<i64: 1>, scalar_prefetch = 0 : i64, scratch_operands = 0 : i64, tpu.core_type = #tpu.core_type<tc>, window_params = [{transform_indices = @transform_0, window_bounds = array<i64: 8, 128>}, {pipeline_mode = #tpu.pipeline_mode<synchronous>, transform_indices = @transform_1, window_bounds = array<i64: 128, 50>}, {pipeline_mode = #tpu.pipeline_mode<synchronous>, transform_indices = @transform_2, window_bounds = array<i64: 1, 50>}, {pipeline_mode = #tpu.pipeline_mode<synchronous>, transform_indices = @transform_3, window_bounds = array<i64: 50, 20>}, {pipeline_mode = #tpu.pipeline_mode<synchronous>, transform_indices = @transform_4, window_bounds = array<i64: 1, 20>}, {pipeline_mode = #tpu.pipeline_mode<synchronous>, transform_indices = @transform_5, window_bounds = array<i64: 20, 9>}, {pipeline_mode = #tpu.pipeline_mode<synchronous>, transform_indices = @transform_6, window_bounds = array<i64: 1, 9>}, {transform_indices = @transform_7, window_bounds = array<i64: 8, 9>}]} {
    %c0 = arith.constant 0 : index
    %c0_0 = arith.constant 0 : index
    %0 = vector.load %arg1[%c0, %c0_0] : memref<8x128xf32, #tpu.memory_space<vmem>>, vector<8x128xf32>
    %c0_1 = arith.constant 0 : index
    %c0_2 = arith.constant 0 : index
    %1 = vector.load %arg2[%c0_1, %c0_2] : memref<128x50xf32, #tpu.memory_space<vmem>>, vector<128x50xf32>
    %cst = arith.constant dense<0.000000e+00> : vector<8x50xf32>
    %2 = tpu.matmul %0, %1, %cst {dimension_numbers = #tpu.dot_dimension_numbers<[1], [0], [0], [1], [0, 0, 1, 1], [], []>} : vector<8x128xf32>, vector<128x50xf32>, vector<8x50xf32> -> vector<8x50xf32>
    %c0_3 = arith.constant 0 : index
    %c0_4 = arith.constant 0 : index
    %3 = vector.load %arg3[%c0_3, %c0_4] : memref<1x50xf32, #tpu.memory_space<vmem>>, vector<1x50xf32>
    %4 = vector.broadcast %3 : vector<1x50xf32> to vector<8x50xf32>
    %5 = arith.addf %2, %4 : vector<8x50xf32>
    %cst_5 = arith.constant 0.000000e+00 : f32
    %6 = vector.broadcast %cst_5 : f32 to vector<8x50xf32>
    %7 = arith.maximumf %5, %6 : vector<8x50xf32>
    %c0_6 = arith.constant 0 : index
    %c0_7 = arith.constant 0 : index
    %8 = vector.load %arg4[%c0_6, %c0_7] : memref<50x20xf32, #tpu.memory_space<vmem>>, vector<50x20xf32>
    %cst_8 = arith.constant dense<0.000000e+00> : vector<8x20xf32>
    %9 = tpu.matmul %7, %8, %cst_8 {dimension_numbers = #tpu.dot_dimension_numbers<[1], [0], [0], [1], [0, 0, 1, 1], [], []>} : vector<8x50xf32>, vector<50x20xf32>, vector<8x20xf32> -> vector<8x20xf32>
    %c0_9 = arith.constant 0 : index
    %c0_10 = arith.constant 0 : index
    %10 = vector.load %arg5[%c0_9, %c0_10] : memref<1x20xf32, #tpu.memory_space<vmem>>, vector<1x20xf32>
    %11 = vector.broadcast %10 : vector<1x20xf32> to vector<8x20xf32>
    %12 = arith.addf %9, %11 : vector<8x20xf32>
    %cst_11 = arith.constant 0.000000e+00 : f32
    %13 = vector.broadcast %cst_11 : f32 to vector<8x20xf32>
    %14 = arith.maximumf %12, %13 : vector<8x20xf32>
    %c0_12 = arith.constant 0 : index
    %c0_13 = arith.constant 0 : index
    %15 = vector.load %arg6[%c0_12, %c0_13] : memref<20x9xf32, #tpu.memory_space<vmem>>, vector<20x9xf32>
    %cst_14 = arith.constant dense<0.000000e+00> : vector<8x9xf32>
    %16 = tpu.matmul %14, %15, %cst_14 {dimension_numbers = #tpu.dot_dimension_numbers<[1], [0], [0], [1], [0, 0, 1, 1], [], []>} : vector<8x20xf32>, vector<20x9xf32>, vector<8x9xf32> -> vector<8x9xf32>
    %c0_15 = arith.constant 0 : index
    %c0_16 = arith.constant 0 : index
    %17 = vector.load %arg7[%c0_15, %c0_16] : memref<1x9xf32, #tpu.memory_space<vmem>>, vector<1x9xf32>
    %18 = vector.broadcast %17 : vector<1x9xf32> to vector<8x9xf32>
    %19 = arith.addf %16, %18 : vector<8x9xf32>
    %c0_17 = arith.constant 0 : index
    %c0_18 = arith.constant 0 : index
    %20 = vector.load %arg8[%c0_17, %c0_18] : memref<8x9xf32, #tpu.memory_space<vmem>>, vector<8x9xf32>
    tpu.vector_store %arg8[%c0_17, %c0_18], %19 {strides = array<i32>} : memref<8x9xf32, #tpu.memory_space<vmem>>, vector<8x9xf32>,
    return
  }
  func.func @transform_0(%arg0: i32) -> (i32, i32) {
    %c0_i32 = arith.constant 0 : i32
    %c0_i32_0 = arith.constant 0 : i32
    return %arg0, %c0_i32 : i32, i32
  }
  func.func @transform_1(%arg0: i32) -> (i32, i32) {
    %c0_i32 = arith.constant 0 : i32
    %c0_i32_0 = arith.constant 0 : i32
    %c0_i32_1 = arith.constant 0 : i32
    return %c0_i32, %c0_i32_0 : i32, i32
  }
  func.func @transform_2(%arg0: i32) -> (i32, i32) {
    %c0_i32 = arith.constant 0 : i32
    %c0_i32_0 = arith.constant 0 : i32
    %c0_i32_1 = arith.constant 0 : i32
    return %c0_i32, %c0_i32_0 : i32, i32
  }
  func.func @transform_3(%arg0: i32) -> (i32, i32) {
    %c0_i32 = arith.constant 0 : i32
    %c0_i32_0 = arith.constant 0 : i32
    %c0_i32_1 = arith.constant 0 : i32
    return %c0_i32, %c0_i32_0 : i32, i32
  }
  func.func @transform_4(%arg0: i32) -> (i32, i32) {
    %c0_i32 = arith.constant 0 : i32
    %c0_i32_0 = arith.constant 0 : i32
    %c0_i32_1 = arith.constant 0 : i32
    return %c0_i32, %c0_i32_0 : i32, i32
  }
  func.func @transform_5(%arg0: i32) -> (i32, i32) {
    %c0_i32 = arith.constant 0 : i32
    %c0_i32_0 = arith.constant 0 : i32
    %c0_i32_1 = arith.constant 0 : i32
    return %c0_i32, %c0_i32_0 : i32, i32
  }
  func.func @transform_6(%arg0: i32) -> (i32, i32) {
    %c0_i32 = arith.constant 0 : i32
    %c0_i32_0 = arith.constant 0 : i32
    %c0_i32_1 = arith.constant 0 : i32
    return %c0_i32, %c0_i32_0 : i32, i32
  }
  func.func @transform_7(%arg0: i32) -> (i32, i32) {
    %c0_i32 = arith.constant 0 : i32
    %c0_i32_0 = arith.constant 0 : i32
    return %arg0, %c0_i32 : i32, i32
  }
}

</mosaic_0001>

<bundles_post_ra>
// kernel: tpu_custom_call.1
= control target key start
LH: loop header
LB: loop body
LE: loop exit
PB: predicated region body
PF: predicated region fallthrough
CT: control target
= control target key end

     0   :  { %v480_v3 = vmov 0.0|0.0   ;;  %vm481_vm0 = vmmov 0   ;;  %v482_v6 = vmov 0.0   ;;  %s646_s0 = inlined_call_operand.vmem [shape: f32[8,128], index: 0, kind: input, shape index: {}]   ;;  %s647_s1 = inlined_call_operand.vmem [shape: f32[128,50], index: 1, kind: input, shape index: {}]   ;;  %s648_s2 = inlined_call_operand.vmem [shape: f32[1,50], index: 2, kind: input, shape index: {}]   ;;  %s649_s3 = inlined_call_operand.vmem [shape: f32[50,20], index: 3, kind: input, shape index: {}]   ;;  %s650_s4 = inlined_call_operand.vmem [shape: f32[1,20], index: 4, kind: input, shape index: {}]   ;;  %s651_s5 = inlined_call_operand.vmem [shape: f32[20,9], index: 5, kind: input, shape index: {}]   ;;  %s652_s6 = inlined_call_operand.vmem [shape: f32[1,9], index: 6, kind: input, shape index: {}]   ;;  %s653_s7 = inlined_call_operand.hbm [shape: f32[8,9], index: 7, kind: output, shape index: {}]  }
   0x1   :  { %v28_v0 = vld [vmem:[%s647_s1] sm:$0xff]  ;;  %v29_v1 = vld [vmem:[%s647_s1 + $0x8] sm:$0xff]  ;;  %v30_v2 = vld [vmem:[%s647_s1 + $0x10] sm:$0xff]  ;;  %416 = vmatprep.subr.bf16.mxu0 %v480_v3  ;;  %387 = vmatprep.mubr.msk.f32.mxu0 %vm481_vm0, %v482_v6 }
   0x2   :  { %v417_v4 = vpack.c.bf16 %v29_v1, %v28_v0  ;;  %v31_v5 = vld [vmem:[%s647_s1 + $0x18] sm:$0xff]  ;;  %440 = vmatprep.subr.bf16.mxu1 %v480_v3  ;;  %404 = vmatprep.mubr.msk.f32.mxu1 %vm481_vm0, %v482_v6  ;;  %v32_v8 = vld [vmem:[%s647_s1 + $0x20] sm:$0xff]  ;;  %v33_v9 = vld [vmem:[%s647_s1 + $0x28] sm:$0xff] }
   0x3   :  { %v420_v7 = vpack.c.bf16 %v31_v5, %v30_v2  ;;  %v122_v10 = vld [vmem:[%s649_s3] sm:$0xff]  ;;  %v123_v11 = vld [vmem:[%s649_s3 + $0x8] sm:$0xff]  ;;  %v124_v12 = vld [vmem:[%s649_s3 + $0x10] sm:$0xff]  ;;  %v423_v14 = vpack.c.bf16 %v33_v9, %v32_v8 }
   0x4   :  { %418 = vmatpush3.bf16.msra.mxu0 %v417_v4  ;;  %v125_v13 = vld [vmem:[%s649_s3 + $0x18] sm:$0xff]  ;;  %v441_v15 = vpack.c.bf16 %v123_v11, %v122_v10 }
   0x5   :  { %419 = vmatprep.subr.bf16.mxu0 %v480_v3 }
   0x8   :  { %421 = vmatpush3.bf16.msra.mxu0 %v420_v7 }
   0x9   :  { %12 = vsyncpa [#allocation3], 0  ;;  %422 = vmatprep.subr.bf16.mxu0 %v480_v3  ;;  %v34_v16 = vld [vmem:[%s647_s1 + $0x30] sm:$0xff]  ;;  %v35_v17 = vld [vmem:[%s647_s1 + $0x38] sm:$0xff]  ;;  %442 = vmatpush3.bf16.msra.mxu1 %v441_v15  ;;  %v444_v18 = vpack.c.bf16 %v125_v13, %v124_v12  ;;  %vm140_vm1 = vcmask 1041408   ;;  %vm136_vm2 = vcmask 408576  }
   0xa   :  { %443 = vmatprep.subr.bf16.mxu1 %v480_v3  ;;  %v426_v19 = vpack.c.bf16 %v35_v17, %v34_v16  ;;  %v36_v20 = vld [vmem:[%s647_s1 + $0x40] sm:$0xff]  ;;  %v37_v21 = vld [vmem:[%s647_s1 + $0x48] sm:$0xff]  ;;  %v38_v23 = vld [vmem:[%s647_s1 + $0x50] sm:$0xff]  ;;  %vm229_vm3 = vcmask 1043456   ;;  %vm225_vm4 = vcmask 162816   ;;  %s483_s11 = smov [#allocation2]  }
   0xb   :  { %v429_v22 = vpack.c.bf16 %v37_v21, %v36_v20  ;;  %v39_v24 = vld [vmem:[%s647_s1 + $0x58] sm:$0xff]  ;;  %v40_v26 = vld [vmem:[%s647_s1 + $0x60] sm:$0xff]  ;;  %v41_v27 = vld [vmem:[%s647_s1 + $0x68] sm:$0xff]  ;;  %s311_s12 = sshll.u32 %s483_s11, 4  ;;  %vm303_vm5 = vcmask 72704   ;;  %s312_s12 = int_to_ptr.vmem [resolvable:$true] %s311_s12 }
   0xc   :  { %424 = vmatpush3.bf16.msra.mxu0 %v423_v14  ;;  %v432_v25 = vpack.c.bf16 %v39_v24, %v38_v23  ;;  %v435_v28 = vpack.c.bf16 %v41_v27, %v40_v26  ;;  %v42_v29 = vld [vmem:[%s647_s1 + $0x70] sm:$0xff]  ;;  %v43_v30 = vld [vmem:[%s647_s1 + $0x78] sm:$0xff]  ;;  %v27_v32 = vld [vmem:[%s646_s0] sm:$0xff]  ;;  %p461_p1 = scmp.lt.s32.totalorder %s312_s12, %s312_s12 }
   0xd   :  { %425 = vmatprep.subr.bf16.mxu0 %v480_v3  ;;  %445 = vmatpush3.bf16.msra.mxu1 %v444_v18  ;;  %v438_v31 = vpack.c.bf16 %v43_v30, %v42_v29  ;;  %v126_v33 = vld [vmem:[%s649_s3 + $0x20] sm:$0xff]  ;;  %v127_v34 = vld [vmem:[%s649_s3 + $0x28] sm:$0xff]  ;;  %v128_v36 = vld [vmem:[%s649_s3 + $0x30] sm:$0x3] }
   0xe   :  { %446 = vmatprep.subr.bf16.mxu1 %v480_v3  ;;  %v447_v35 = vpack.c.bf16 %v127_v34, %v126_v33  ;;  %v319_v37 = vld [vmem:[%s648_s2] ss:$0 sm:$0xff]  ;;  %v216_v39 = vld [vmem:[%s651_s5 + $0x8] sm:$0xff]  ;;  %v217_v45 = vld [vmem:[%s651_s5 + $0x10] sm:$0xf] }
   0xf   :  { %v215_v38 = vld [vmem:[%s651_s5] sm:$0xff]  ;;  %s456_s5 = scalar_lea.vmem %s312_s12, 128 }
  0x10   :  { %427 = vmatpush3.bf16.msra.mxu0 %v426_v19  ;;  %v450_v43 = vpack.c.bf16 %v216_v39, %v215_v38  ;;  %v320_v46 = vld [vmem:[%s650_s4] ss:$0 sm:$0xff]  ;;  %p457_p0 = scmp.ne.s32.totalorder %s312_s12, %s456_s5  ;;  %p462_p2 = scmp.lt.s32.totalorder %s456_s5, %s456_s5 }
  0x11   :  { %428 = vmatprep.subr.bf16.mxu0 %v480_v3  ;;  %448 = vmatpush3.bf16.msra.mxu1 %v447_v35  ;;  %v323_v51 = vld [vmem:[%s652_s6] ss:$0 sm:$0xff] }
  0x12   :  { %402 = vmatprep.subr.mxu1 %v482_v6  ;;  %p463_p3 = por %p462_p2, %p461_p1 }
  0x14   :  { %430 = vmatpush3.bf16.msra.mxu0 %v429_v22  ;;  %p464_p4 = pnand %p463_p3, %p457_p0 }
  0x15   :  { %431 = vmatprep.subr.bf16.mxu0 %v480_v3  ;;  %403 = vmatpush3.msk.msra.mxu1 %vm140_vm1, %v128_v36 }
  0x16   :  { %449 = vmatprep.subr.bf16.mxu1 %v480_v3 }
  0x18   :  { %433 = vmatpush3.bf16.msra.mxu0 %v432_v25 }
  0x19   :  { %434 = vmatprep.subr.bf16.mxu0 %v480_v3 }
  0x1c   :  { %436 = vmatpush3.bf16.msra.mxu0 %v435_v28 }
  0x1d   :  { %437 = vmatprep.subr.bf16.mxu0 %v480_v3 }
  0x20   :  { %439 = vmatpush3.bf16.msra.mxu0 %v438_v31 }
  0x23   :  { %388 = vmatmul.mubr.f32.vlgmr.msra.gmra.mrb[0].mxu0 %v27_v32 }
  0xf6   :  { %v117_v40 = vpop.f32.mrb[0].mxu0 }
  0xf7   :  { %v118_v41 = vadd.f32 %v319_v37, %v117_v40  ;;  %v389_v42 = vpop.f32.mrb[1].mxu0 }
  0xf9   :  { %v121_v44 = vmax.f32 %v118_v41, 0.0 }
  0xfb   :  { %405 = vmatmul.mubr.msk.f32.vlgmr.msra.gmra.mrb[0].mxu1 %vm136_vm2, %v121_v44 }
  0xfc   :  { %451 = vmatpush3.bf16.msra.mxu1 %v450_v43  ;;  %413 = vmatprep.mubr.msk.f32.mxu1 %vm481_vm0, %v482_v6 }
  0xfd   :  { %411 = vmatprep.subr.mxu1 %v482_v6 }
 0x100   :  { %412 = vmatpush3.msk.msra.mxu1 %vm229_vm3, %v217_v45 }
 0x1ce   :  { %v210_v47 = vpop.f32.mrb[0].mxu1 }
 0x1cf   :  { %v211_v48 = vadd.f32 %v320_v46, %v210_v47  ;;  %v406_v49 = vpop.f32.mrb[1].mxu1 }
 0x1d1   :  { %v214_v50 = vmax.f32 %v211_v48, 0.0 }
 0x1d3   :  { %414 = vmatmul.mubr.msk.f32.vlgmr.msra.gmra.mrb[2].mxu1 %vm225_vm4, %v214_v50 }
 0x2a6   :  { %v299_v52 = vpop.f32.mrb[2].mxu1 }
 0x2a7   :  { %v300_v53 = vadd.f32 %v323_v51, %v299_v52  ;;  %v415_v54 = vpop.f32.mrb[3].mxu1 }
 0x2a9   :  { %304 = vst.msk [vmem:[#allocation2] sm:$0xff] %vm303_vm5, %v300_v53 }
 0x2aa   :  { %467 = shalt.err (!%p464_p4)
}
 0x2ab   :  { %s468_s14 = scalar_lea.hbm %s653_s7, 128 }
 0x2ac   :  { %p469_p5 = scmp.ne.s32.totalorder %s653_s7, %s468_s14  ;;  %p472_p6 = scmp.lt.u32.totalorder %s468_s14, %s653_s7 }
 0x2ae   :  { %p474_p7 = pnand %p472_p6, %p469_p5 }
 0x2b0   :  { %477 = shalt.err (!%p474_p7)
}
 0x2b1   :  { %314 = dma.vmem_to_hbm [thread:$0]  %s312_s12, 128, %s653_s7, [#allocation3]  }
 0x2b2   :  { %478 = dma.done.wait [#allocation3], 128  }
 0x2b3   :  { %479 = vsyncadd [#allocation3], 4294967168 }
 0x2b4   :  { %318 = vsyncpa [#allocation3], 1 }

</bundles_post_ra>
